<compile_context>
chip_gen: v6e
topology: v6e:2x2x1
jax: 0.10.0
libtpu: 0.0.40
codegen_flags: <defaults>
</compile_context>

<pallas_src>
import functools

import jax
import jax.numpy as jnp
from jax import lax
from jax.experimental import pallas as pl
from jax.experimental.pallas import tpu as pltpu

LANE = 128


def _mse_kernel(p_ref, l_ref, o_ref, acc_ref, *, rt, rows, chunk):
    k = pl.program_id(0)

    # Zero the vreg-shaped accumulator at the start of the sweep.
    @pl.when(k == 0)
    def _():
        acc_ref[...] = jnp.zeros_like(acc_ref)

    n_chunks = rt // chunk  # static

    def _accum(dsq):
        if chunk % 8 == 0:
            # Group rows into (8, 128) vregs and add them -> pure VPU adds.
            acc_ref[...] += dsq.reshape(chunk // 8, 8, LANE).sum(axis=0)
        else:
            # Tiny-input fallback (rows < 8): accumulator matches block shape.
            acc_ref[...] += dsq

    def _load_sq(off):
        # cast -> sub -> mul on one small chunk; live range is a few vregs.
        p = p_ref[pl.ds(off, chunk), :].astype(jnp.float32)
        l = l_ref[pl.ds(off, chunk), :].astype(jnp.float32)
        d = p - l
        return d * d

    def full_body(c, carry):
        off = pl.multiple_of(c * chunk, chunk)
        _accum(_load_sq(off))
        return carry

    def masked_body(c, carry):
        # Only the last (partial) row-block takes this path: mask rows past the
        # end of the array (their block-buffer contents are garbage).
        # TODO(synk): row index math is int32; fine up to ~2^31 rows.
        off = pl.multiple_of(c * chunk, chunk)
        dsq = _load_sq(off)
        row = (k * rt + c * chunk
               + lax.broadcasted_iota(jnp.int32, (chunk, LANE), 0))
        _accum(jnp.where(row < rows, dsq, 0.0))
        return carry

    is_full = (k + 1) * rt <= rows

    @pl.when(is_full)
    def _():
        lax.fori_loop(0, n_chunks, full_body, 0, unroll=True)

    @pl.when(jnp.logical_not(is_full))
    def _():
        lax.fori_loop(0, n_chunks, masked_body, 0, unroll=True)

    # Epilogue: one cross-sublane reduction; lanes summed (and 1/N applied) in
    # the wrapper.
    @pl.when(k == pl.num_programs(0) - 1)
    def _():
        o_ref[...] = acc_ref[...].sum(axis=0, keepdims=True)


def mse_loss_pallas(pred, label, *, row_tile=None):
    assert pred.shape == label.shape
    total = pred.size
    assert total > 0

    # Flatten (free metadata reshape when contiguous); keep native dtypes.
    p_flat = jnp.ravel(pred)
    l_flat = jnp.ravel(label)

    # Ragged tail (< 128 elements) handled in plain JAX — no full-array pad.
    tail = total % LANE
    main = total - tail
    rows = main // LANE

    if tail:
        tp = p_flat[main:].astype(jnp.float32)
        tl = l_flat[main:].astype(jnp.float32)
        tail_sum = jnp.sum((tp - tl) ** 2)
    else:
        tail_sum = jnp.float32(0.0)

    if rows == 0:
        # Input smaller than one lane row: nothing for the kernel to do.
        return tail_sum / total

    p2 = (p_flat[:main] if tail else p_flat).reshape(rows, LANE)
    l2 = (l_flat[:main] if tail else l_flat).reshape(rows, LANE)

    itemsize = max(p2.dtype.itemsize, l2.dtype.itemsize)

    if row_tile is None:
        # Size so 2 inputs x 2 pipeline buffers fit in ~16 MiB of VMEM:
        # f32 -> 8192 rows (16 MiB), bf16/fp16 -> 16384 rows (16 MiB).
        budget = 16 * 1024 * 1024
        row_tile = max(8, budget // (4 * LANE * itemsize))
    row_tile = max(8, (row_tile // 8) * 8)

    # Largest tile that is a multiple of 8 rows (or the full array for tiny
    # inputs) and does not exceed the array's row count.
    if rows >= row_tile:
        rt = row_tile
    elif rows % 8 == 0 or rows < 8:
        rt = rows
    else:
        rt = (rows // 8) * 8

    # Inner accumulation chunk (rows per fori_loop iteration).
    if rt % 64 == 0:
        chunk = 64
    elif rt % 8 == 0:
        chunk = 8
    else:
        chunk = rt  # tiny-input fallback (rows < 8)

    steps = pl.cdiv(rows, rt)
    acc_rows = 8 if rt % 8 == 0 else rt

    # Input double-buffers + headroom for the tiny accumulator/output/scratch.
    vmem_limit = int(2 * 2 * rt * LANE * itemsize + (8 << 20))

    kernel = functools.partial(_mse_kernel, rt=rt, rows=rows, chunk=chunk)

    partial_sums = pl.pallas_call(
        kernel,
        out_shape=jax.ShapeDtypeStruct((1, LANE), jnp.float32),
        grid_spec=pltpu.PrefetchScalarGridSpec(
            num_scalar_prefetch=0,
            grid=(steps,),
            in_specs=[
                pl.BlockSpec((rt, LANE), lambda k: (k, 0)),
                pl.BlockSpec((rt, LANE), lambda k: (k, 0)),
            ],
            out_specs=pl.BlockSpec((1, LANE), lambda k: (0, 0)),
            scratch_shapes=[pltpu.VMEM((acc_rows, LANE), jnp.float32)],
        ),
        compiler_params=pltpu.CompilerParams(
            dimension_semantics=("arbitrary",),
            vmem_limit_bytes=vmem_limit,
        ),
    )(p2, l2)

    # Tiny cross-lane finish + 1/N scale in plain JAX.
    return (jnp.sum(partial_sums) + tail_sum) / total


class Loss:
    """JAX/Pallas port of the PyTorch `Loss` module (MSE semantics assumed)."""

    def __init__(self, *kwargs):
        self.kwargs = kwargs  # no parameters in the reference module

    def __call__(self, pred, label):
        return mse_loss_pallas(pred, label)


if __name__ == "__main__":
    key = jax.random.PRNGKey(0)
    kp, kl = jax.random.split(key)

    loss_mod = Loss()

    # Primary check: small image-style prediction/label pair (f32).
    pred = jax.random.normal(kp, (2, 4, 16, 16), dtype=jnp.float32)
    label = jax.random.normal(kl, (2, 4, 16, 16), dtype=jnp.float32)
    out = jax.block_until_ready(loss_mod(pred, label))
    ref = jnp.mean((pred - label) ** 2)
    assert jnp.allclose(out, ref, rtol=1e-5, atol=1e-5), (out, ref)

    # Ragged-shape check (exercises the wrapper tail path and the in-kernel
    # masked partial row-block).
    kp2, kl2 = jax.random.split(kl)
    pred_r = jax.random.normal(kp2, (3, 5, 7, 11), dtype=jnp.float32)
    label_r = jax.random.normal(kl2, (3, 5, 7, 11), dtype=jnp.float32)
    out_r = jax.block_until_ready(loss_mod(pred_r, label_r))
    ref_r = jnp.mean((pred_r - label_r) ** 2)
    assert jnp.allclose(out_r, ref_r, rtol=1e-5, atol=1e-5), (out_r, ref_r)

    # bf16 path check (no wrapper upcast; cast happens per-chunk in-kernel).
    pred_b = pred.astype(jnp.bfloat16)
    label_b = label.astype(jnp.bfloat16)
    out_b = jax.block_until_ready(loss_mod(pred_b, label_b))
    ref_b = jnp.mean(
        (pred_b.astype(jnp.float32) - label_b.astype(jnp.float32)) ** 2)
    assert jnp.allclose(out_b, ref_b, rtol=1e-5, atol=1e-5), (out_b, ref_b)

    print("KERNEL_OK")
</pallas_src>

<mosaic_0001>
module attributes {stable_mosaic.version = 11 : i64} {
  func.func @_mse_kernel(%arg0: i32, %arg1: memref<16x128xf32, #tpu.memory_space<vmem>>, %arg2: memref<16x128xf32, #tpu.memory_space<vmem>>, %arg3: memref<1x128xf32, #tpu.memory_space<vmem>>, %arg4: memref<8x128xf32, #tpu.memory_space<vmem>>) attributes {dimension_semantics = [#tpu.dimension_semantics<arbitrary>], iteration_bounds = array<i64: 1>, scalar_prefetch = 0 : i64, scratch_operands = 1 : i64, tpu.core_type = #tpu.core_type<tc>, window_params = [{transform_indices = @transform_0, window_bounds = array<i64: 16, 128>}, {transform_indices = @transform_1, window_bounds = array<i64: 16, 128>}, {pipeline_mode = #tpu.pipeline_mode<synchronous>, transform_indices = @transform_2, window_bounds = array<i64: 1, 128>}]} {
    %c0_i32 = arith.constant 0 : i32
    %0 = arith.cmpi eq, %arg0, %c0_i32 : i32
    %1 = arith.extui %0 : i1 to i32
    %c0_i32_0 = arith.constant 0 : i32
    %2 = arith.cmpi ne, %1, %c0_i32_0 : i32
    scf.if %2 {
      %cst = arith.constant 0.000000e+00 : f32
      %14 = vector.broadcast %cst : f32 to vector<8x128xf32>
      %c0 = arith.constant 0 : index
      %c0_6 = arith.constant 0 : index
      %15 = vector.load %arg4[%c0, %c0_6] : memref<8x128xf32, #tpu.memory_space<vmem>>, vector<8x128xf32>
      tpu.vector_store %arg4[%c0, %c0_6], %14 {strides = array<i32>} : memref<8x128xf32, #tpu.memory_space<vmem>>, vector<8x128xf32>,
    } else {
    }
    %c1_i32 = arith.constant 1 : i32
    %3 = arith.addi %arg0, %c1_i32 : i32
    %c16_i32 = arith.constant 16 : i32
    %4 = arith.muli %3, %c16_i32 : i32
    %c16_i32_1 = arith.constant 16 : i32
    %5 = arith.cmpi sle, %4, %c16_i32_1 : i32
    %6 = arith.extui %5 : i1 to i32
    %c0_i32_2 = arith.constant 0 : i32
    %7 = arith.cmpi ne, %6, %c0_i32_2 : i32
    scf.if %7 {
      %c0_i32_6 = arith.constant 0 : i32
      %c8_i32 = arith.constant 8 : i32
      %14 = arith.muli %c0_i32_6, %c8_i32 : i32
      %15 = tpu.assume_multiple %14, 8 : i32
      %16 = arith.index_cast %15 : i32 to index
      %c0 = arith.constant 0 : index
      %17 = vector.load %arg1[%16, %c0] : memref<16x128xf32, #tpu.memory_space<vmem>>, vector<8x128xf32>
      %18 = arith.index_cast %15 : i32 to index
      %c0_7 = arith.constant 0 : index
      %19 = vector.load %arg2[%18, %c0_7] : memref<16x128xf32, #tpu.memory_space<vmem>>, vector<8x128xf32>
      %20 = arith.subf %17, %19 : vector<8x128xf32>
      %21 = arith.mulf %20, %20 : vector<8x128xf32>
      %c0_8 = arith.constant 0 : index
      %c0_9 = arith.constant 0 : index
      %22 = vector.load %arg4[%c0_8, %c0_9] : memref<8x128xf32, #tpu.memory_space<vmem>>, vector<8x128xf32>
      %23 = vector.shape_cast %21 : vector<8x128xf32> to vector<1x8x128xf32>
      %cst = arith.constant dense<0.000000e+00> : vector<8x128xf32>
      %24 = vector.multi_reduction <add>, %23, %cst [0] : vector<1x8x128xf32> to vector<8x128xf32>
      %25 = arith.addf %22, %24 : vector<8x128xf32>
      %c0_10 = arith.constant 0 : index
      %c0_11 = arith.constant 0 : index
      %26 = vector.load %arg4[%c0_10, %c0_11] : memref<8x128xf32, #tpu.memory_space<vmem>>, vector<8x128xf32>
      tpu.vector_store %arg4[%c0_10, %c0_11], %25 {strides = array<i32>} : memref<8x128xf32, #tpu.memory_space<vmem>>, vector<8x128xf32>,
      %c1_i32_12 = arith.constant 1 : i32
      %c8_i32_13 = arith.constant 8 : i32
      %27 = arith.muli %c1_i32_12, %c8_i32_13 : i32
      %28 = tpu.assume_multiple %27, 8 : i32
      %29 = arith.index_cast %28 : i32 to index
      %c0_14 = arith.constant 0 : index
      %30 = vector.load %arg1[%29, %c0_14] : memref<16x128xf32, #tpu.memory_space<vmem>>, vector<8x128xf32>
      %31 = arith.index_cast %28 : i32 to index
      %c0_15 = arith.constant 0 : index
      %32 = vector.load %arg2[%31, %c0_15] : memref<16x128xf32, #tpu.memory_space<vmem>>, vector<8x128xf32>
      %33 = arith.subf %30, %32 : vector<8x128xf32>
      %34 = arith.mulf %33, %33 : vector<8x128xf32>
      %c0_16 = arith.constant 0 : index
      %c0_17 = arith.constant 0 : index
      %35 = vector.load %arg4[%c0_16, %c0_17] : memref<8x128xf32, #tpu.memory_space<vmem>>, vector<8x128xf32>
      %36 = vector.shape_cast %34 : vector<8x128xf32> to vector<1x8x128xf32>
      %cst_18 = arith.constant dense<0.000000e+00> : vector<8x128xf32>
      %37 = vector.multi_reduction <add>, %36, %cst_18 [0] : vector<1x8x128xf32> to vector<8x128xf32>
      %38 = arith.addf %35, %37 : vector<8x128xf32>
      %c0_19 = arith.constant 0 : index
      %c0_20 = arith.constant 0 : index
      %39 = vector.load %arg4[%c0_19, %c0_20] : memref<8x128xf32, #tpu.memory_space<vmem>>, vector<8x128xf32>
      tpu.vector_store %arg4[%c0_19, %c0_20], %38 {strides = array<i32>} : memref<8x128xf32, #tpu.memory_space<vmem>>, vector<8x128xf32>,
      %c2_i32 = arith.constant 2 : i32
    } else {
    }
    %true = arith.constant true
    %8 = arith.xori %5, %true : i1
    %9 = arith.extui %8 : i1 to i32
    %c0_i32_3 = arith.constant 0 : i32
    %10 = arith.cmpi ne, %9, %c0_i32_3 : i32
    scf.if %10 {
      %c0_i32_6 = arith.constant 0 : i32
      %c8_i32 = arith.constant 8 : i32
      %14 = arith.muli %c0_i32_6, %c8_i32 : i32
      %15 = tpu.assume_multiple %14, 8 : i32
      %16 = arith.index_cast %15 : i32 to index
      %c0 = arith.constant 0 : index
      %17 = vector.load %arg1[%16, %c0] : memref<16x128xf32, #tpu.memory_space<vmem>>, vector<8x128xf32>
      %18 = arith.index_cast %15 : i32 to index
      %c0_7 = arith.constant 0 : index
      %19 = vector.load %arg2[%18, %c0_7] : memref<16x128xf32, #tpu.memory_space<vmem>>, vector<8x128xf32>
      %20 = arith.subf %17, %19 : vector<8x128xf32>
      %21 = arith.mulf %20, %20 : vector<8x128xf32>
      %c16_i32_8 = arith.constant 16 : i32
      %22 = arith.muli %arg0, %c16_i32_8 : i32
      %c8_i32_9 = arith.constant 8 : i32
      %23 = arith.muli %c0_i32_6, %c8_i32_9 : i32
      %24 = arith.addi %22, %23 : i32
      %25 = tpu.iota {dimensions = array<i32: 0>} : vector<8x128xi32>
      %26 = vector.broadcast %24 : i32 to vector<8x128xi32>
      %27 = arith.addi %26, %25 : vector<8x128xi32>
      %c16_i32_10 = arith.constant 16 : i32
      %28 = vector.broadcast %c16_i32_10 : i32 to vector<8x128xi32>
      %29 = arith.cmpi slt, %27, %28 : vector<8x128xi32>
      %cst = arith.constant 0.000000e+00 : f32
      %30 = vector.broadcast %cst : f32 to vector<8x128xf32>
      %31 = arith.select %29, %21, %30 : vector<8x128xi1>, vector<8x128xf32>
      %c0_11 = arith.constant 0 : index
      %c0_12 = arith.constant 0 : index
      %32 = vector.load %arg4[%c0_11, %c0_12] : memref<8x128xf32, #tpu.memory_space<vmem>>, vector<8x128xf32>
      %33 = vector.shape_cast %31 : vector<8x128xf32> to vector<1x8x128xf32>
      %cst_13 = arith.constant dense<0.000000e+00> : vector<8x128xf32>
      %34 = vector.multi_reduction <add>, %33, %cst_13 [0] : vector<1x8x128xf32> to vector<8x128xf32>
      %35 = arith.addf %32, %34 : vector<8x128xf32>
      %c0_14 = arith.constant 0 : index
      %c0_15 = arith.constant 0 : index
      %36 = vector.load %arg4[%c0_14, %c0_15] : memref<8x128xf32, #tpu.memory_space<vmem>>, vector<8x128xf32>
      tpu.vector_store %arg4[%c0_14, %c0_15], %35 {strides = array<i32>} : memref<8x128xf32, #tpu.memory_space<vmem>>, vector<8x128xf32>,
      %c1_i32_16 = arith.constant 1 : i32
      %c8_i32_17 = arith.constant 8 : i32
      %37 = arith.muli %c1_i32_16, %c8_i32_17 : i32
      %38 = tpu.assume_multiple %37, 8 : i32
      %39 = arith.index_cast %38 : i32 to index
      %c0_18 = arith.constant 0 : index
      %40 = vector.load %arg1[%39, %c0_18] : memref<16x128xf32, #tpu.memory_space<vmem>>, vector<8x128xf32>
      %41 = arith.index_cast %38 : i32 to index
      %c0_19 = arith.constant 0 : index
      %42 = vector.load %arg2[%41, %c0_19] : memref<16x128xf32, #tpu.memory_space<vmem>>, vector<8x128xf32>
      %43 = arith.subf %40, %42 : vector<8x128xf32>
      %44 = arith.mulf %43, %43 : vector<8x128xf32>
      %c16_i32_20 = arith.constant 16 : i32
      %45 = arith.muli %arg0, %c16_i32_20 : i32
      %c8_i32_21 = arith.constant 8 : i32
      %46 = arith.muli %c1_i32_16, %c8_i32_21 : i32
      %47 = arith.addi %45, %46 : i32
      %48 = tpu.iota {dimensions = array<i32: 0>} : vector<8x128xi32>
      %49 = vector.broadcast %47 : i32 to vector<8x128xi32>
      %50 = arith.addi %49, %48 : vector<8x128xi32>
      %c16_i32_22 = arith.constant 16 : i32
      %51 = vector.broadcast %c16_i32_22 : i32 to vector<8x128xi32>
      %52 = arith.cmpi slt, %50, %51 : vector<8x128xi32>
      %cst_23 = arith.constant 0.000000e+00 : f32
      %53 = vector.broadcast %cst_23 : f32 to vector<8x128xf32>
      %54 = arith.select %52, %44, %53 : vector<8x128xi1>, vector<8x128xf32>
      %c0_24 = arith.constant 0 : index
      %c0_25 = arith.constant 0 : index
      %55 = vector.load %arg4[%c0_24, %c0_25] : memref<8x128xf32, #tpu.memory_space<vmem>>, vector<8x128xf32>
      %56 = vector.shape_cast %54 : vector<8x128xf32> to vector<1x8x128xf32>
      %cst_26 = arith.constant dense<0.000000e+00> : vector<8x128xf32>
      %57 = vector.multi_reduction <add>, %56, %cst_26 [0] : vector<1x8x128xf32> to vector<8x128xf32>
      %58 = arith.addf %55, %57 : vector<8x128xf32>
      %c0_27 = arith.constant 0 : index
      %c0_28 = arith.constant 0 : index
      %59 = vector.load %arg4[%c0_27, %c0_28] : memref<8x128xf32, #tpu.memory_space<vmem>>, vector<8x128xf32>
      tpu.vector_store %arg4[%c0_27, %c0_28], %58 {strides = array<i32>} : memref<8x128xf32, #tpu.memory_space<vmem>>, vector<8x128xf32>,
      %c2_i32 = arith.constant 2 : i32
    } else {
    }
    %c0_i32_4 = arith.constant 0 : i32
    %11 = arith.cmpi eq, %arg0, %c0_i32_4 : i32
    %12 = arith.extui %11 : i1 to i32
    %c0_i32_5 = arith.constant 0 : i32
    %13 = arith.cmpi ne, %12, %c0_i32_5 : i32
    scf.if %13 {
      %c0 = arith.constant 0 : index
      %c0_6 = arith.constant 0 : index
      %14 = vector.load %arg4[%c0, %c0_6] : memref<8x128xf32, #tpu.memory_space<vmem>>, vector<8x128xf32>
      %cst = arith.constant dense<0.000000e+00> : vector<128xf32>
      %15 = vector.multi_reduction <add>, %14, %cst [0] : vector<8x128xf32> to vector<128xf32>
      %16 = vector.shape_cast %15 : vector<128xf32> to vector<1x128xf32>
      %c0_7 = arith.constant 0 : index
      %c0_8 = arith.constant 0 : index
      %17 = vector.load %arg3[%c0_7, %c0_8] : memref<1x128xf32, #tpu.memory_space<vmem>>, vector<1x128xf32>
      tpu.vector_store %arg3[%c0_7, %c0_8], %16 {strides = array<i32>} : memref<1x128xf32, #tpu.memory_space<vmem>>, vector<1x128xf32>,
    } else {
    }
    return
  }
  func.func @transform_0(%arg0: i32) -> (i32, i32) {
    %c0_i32 = arith.constant 0 : i32
    %c0_i32_0 = arith.constant 0 : i32
    return %arg0, %c0_i32 : i32, i32
  }
  func.func @transform_1(%arg0: i32) -> (i32, i32) {
    %c0_i32 = arith.constant 0 : i32
    %c0_i32_0 = arith.constant 0 : i32
    return %arg0, %c0_i32 : i32, i32
  }
  func.func @transform_2(%arg0: i32) -> (i32, i32) {
    %c0_i32 = arith.constant 0 : i32
    %c0_i32_0 = arith.constant 0 : i32
    %c0_i32_1 = arith.constant 0 : i32
    return %c0_i32, %c0_i32_0 : i32, i32
  }
}

</mosaic_0001>

<bundles_post_ra>
// kernel: tpu_custom_call.1
= control target key start
LH: loop header
LB: loop body
LE: loop exit
PB: predicated region body
PF: predicated region fallthrough
CT: control target
= control target key end

     0   :  { %7 = vsyncpa [#allocation4], 0  ;;  %s230_s0 = inlined_call_operand.hbm [shape: f32[16,128], index: 0, kind: input, shape index: {}]   ;;  %s231_s1 = inlined_call_operand.hbm [shape: f32[16,128], index: 1, kind: input, shape index: {}]   ;;  %s232_s2 = inlined_call_operand.hbm [shape: f32[1,128], index: 2, kind: output, shape index: {}]  }
   0x1   :  { %8 = vsyncpa [#allocation7], 0 }
   0x2   :  { %9 = vsyncpa [#allocation5], 0  ;;  %s201_s9 = smov [#allocation3]  }
   0x3   :  { %s15_s10 = sshll.u32 %s201_s9, 4  ;;  %s16_s10 = int_to_ptr.vmem [resolvable:$true] %s15_s10 }
   0x4   :  { %s143_s11 = scalar_lea.vmem %s16_s10, 256  ;;  %p148_p1 = scmp.lt.s32.totalorder %s16_s10, %s16_s10 }
   0x5   :  { %p144_p0 = scmp.ne.s32.totalorder %s16_s10, %s143_s11  ;;  %p149_p2 = scmp.lt.s32.totalorder %s143_s11, %s143_s11 }
   0x7   :  { %p150_p3 = por %p149_p2, %p148_p1 }
   0x9   :  { %p151_p4 = pnand %p150_p3, %p144_p0 }
   0xb   :  { %154 = shalt.err (!%p151_p4)
}
   0xc   :  { %s202_s12 = smov 128   ;;  %s203_s13 = smov 8  }
   0xd   :  { %21 = dma.hbm_to_vmem [thread:$0]  %s230_s0, 256, %s16_s10, [#allocation4], %s202_s12, %s202_s12, %s203_s13  }
   0xe   :  { %s204_s16 = smov [#allocation6]  }
   0xf   :  { %s27_s17 = sshll.u32 %s204_s16, 4  ;;  %s28_s17 = int_to_ptr.vmem [resolvable:$true] %s27_s17 }
  0x10   :  { %s163_s18 = scalar_lea.vmem %s28_s17, 256  ;;  %p168_p6 = scmp.lt.s32.totalorder %s28_s17, %s28_s17 }
  0x11   :  { %p164_p5 = scmp.ne.s32.totalorder %s28_s17, %s163_s18  ;;  %p169_p7 = scmp.lt.s32.totalorder %s163_s18, %s163_s18 }
  0x13   :  { %p170_p8 = por %p169_p7, %p168_p6 }
  0x15   :  { %p171_p9 = pnand %p170_p8, %p164_p5 }
  0x17   :  { %174 = shalt.err (!%p171_p9)
}
  0x18   :  { %33 = dma.hbm_to_vmem [thread:$0]  %s231_s1, 256, %s28_s17, [#allocation7], %s202_s12, %s202_s12, %s203_s13  }
  0x19   :  { %195 = dma.done.wait [#allocation4], 256  }
  0x1a   :  { %196 = vsyncadd [#allocation4], 4294967040 }
  0x1b   :  { %197 = dma.done.wait [#allocation7], 256  }
  0x1c   :  { %198 = vsyncadd [#allocation7], 4294967040  ;;  %v51_v0 = vld [vmem:[#allocation3] sm:$0xff]  ;;  %v52_v1 = vld [vmem:[#allocation6] sm:$0xff]  ;;  %s205_s0 = smov [#allocation8]  }
  0x1d   :  { %v60_v2 = vld [vmem:[#allocation3 + $0x8] sm:$0xff]  ;;  %v53_v3 = vsub.f32 %v51_v0, %v52_v1  ;;  %v62_v4 = vld [vmem:[#allocation6 + $0x8] sm:$0xff]  ;;  %s120_s21 = sshll.u32 %s205_s0, 4  ;;  %s121_s21 = int_to_ptr.vmem [resolvable:$true] %s120_s21 }
  0x1e   :  { %v63_v5 = vsub.f32 %v60_v2, %v62_v4  ;;  %s175_s1 = scalar_lea.vmem %s121_s21, 16  ;;  %s179_s22 = scalar_lea.vmem %s121_s21, 32 }
  0x1f   :  { %v54_v6 = vmul.f32 %v53_v3, %v53_v3  ;;  %p176_p10 = scmp.ne.s32.totalorder %s121_s21, %s175_s1  ;;  %p180_p11 = scmp.lt.s32.totalorder %s121_s21, %s121_s21 }
  0x20   :  { %v64_v7 = vmul.f32 %v63_v5, %v63_v5  ;;  %p181_p12 = scmp.lt.s32.totalorder %s179_s22, %s175_s1 }
  0x22   :  { %v67_v8 = vadd.f32 %v64_v7, %v54_v6  ;;  %p182_p13 = por %p181_p12, %p180_p11 }
  0x24   :  { %v107_v9 = vrot.slane %v67_v8, 4  ;;  %p183_p0 = pnand %p182_p13, %p176_p10 }
  0x26   :  { %v108_v10 = vadd.f32 %v107_v9, %v67_v8 }
  0x28   :  { %v109_v11 = vrot.slane %v108_v10, 2 }
  0x2a   :  { %v110_v12 = vadd.f32 %v109_v11, %v108_v10 }
  0x2c   :  { %v111_v13 = vrot.slane %v110_v12, 1 }
  0x2e   :  { %v112_v14 = vadd.f32 %v111_v13, %v110_v12 }
  0x30   :  { %113 = vst [vmem:[#allocation8] sm:$0x1] %v112_v14 }
  0x31   :  { %186 = shalt.err (!%p183_p0)
}
  0x32   :  { %123 = dma.vmem_to_hbm [thread:$0]  %s121_s21, 16, %s232_s2, [#allocation5]  }
  0x33   :  { %199 = dma.done.wait [#allocation5], 16  }
  0x34   :  { %200 = vsyncadd [#allocation5], 4294967280 }
  0x35   :  { %127 = vsyncpa [#allocation4], 1 }
  0x36   :  { %128 = vsyncpa [#allocation7], 1 }
  0x37   :  { %129 = vsyncpa [#allocation5], 1 }

</bundles_post_ra>
